<compile_context>
chip_gen: v5e
topology: v5e:2x2
jax: 0.10.0
libtpu: 0.0.40
codegen_flags: <defaults>
</compile_context>

<pallas_src>
import jax
import jax.numpy as jnp
from jax.experimental import pallas as pl
from jax.experimental.pallas import tpu as pltpu


def _round_up(v, m):
    return ((v + m - 1) // m) * m


def cfconv_kernel(hv_ref, eb_ref, src_ref, dst_ref,
                  w_rad_ref, b_rad_ref,
                  w_post_ref, b_post_ref,
                  out_ref, acc_sc):
    j = pl.program_id(0)
    t_e = eb_ref.shape[0]          # edge tile size (multiple of 128)
    n_p = hv_ref.shape[0]          # padded node count (multiple of 8)

    # --- init (once): zero the [N, H] node accumulator ------------------------
    @pl.when(j == 0)
    def _():
        acc_sc[...] = jnp.zeros_like(acc_sc)

    # --- radial filter for this edge tile (bf16 MXU, f32 accumulate) ----------
    filt = (jnp.dot(eb_ref[...], w_rad_ref[...],
                    preferred_element_type=jnp.float32)
            + b_rad_ref[...])                                    # [tE, H] f32

    # --- build one-hots in-VMEM from the int32 id tiles ------------------------
    # src ids come as a [tE, 1] column  -> src_oh  [tE, N]  (gather layout)
    # dst ids come as a [1, tE] row     -> dst_ohT [N, tE]  (scatter layout,
    # already transposed so the scatter is a plain MXU dot, no XLU transpose).
    # One-hot values (0/1) are exact in bf16; padded edges (id = -1) match nothing.
    iota_ev = jax.lax.broadcasted_iota(jnp.int32, (t_e, n_p), 1)
    src_oh = (src_ref[...] == iota_ev).astype(jnp.bfloat16)      # [tE, N]
    iota_ve = jax.lax.broadcasted_iota(jnp.int32, (n_p, t_e), 0)
    dst_oh_t = (dst_ref[...] == iota_ve).astype(jnp.bfloat16)    # [N, tE]

    # --- gather source node features: h_src[e] = hv[src[e]] (MXU) -------------
    h_src = jnp.dot(src_oh, hv_ref[...],
                    preferred_element_type=jnp.float32)          # [tE, H] f32

    # --- u_mul_e message (f32 VPU), cast to bf16 for the scatter matmul --------
    m = (h_src * filt).astype(jnp.bfloat16)                      # [tE, H]

    # --- scatter-add into the node accumulator: acc += dst_ohT @ m (MXU) -------
    acc_sc[...] += jnp.dot(dst_oh_t, m,
                           preferred_element_type=jnp.float32)   # [N, H] f32

    # --- epilogue (once): post linear + SiLU -----------------------------------
    # NOTE: writing out_ref only on the last step is correct ONLY because the
    # output index_map is constant (block stays resident across the edge axis).
    @pl.when(j == pl.num_programs(0) - 1)
    def _():
        z = (jnp.dot(acc_sc[...].astype(jnp.bfloat16), w_post_ref[...],
                     preferred_element_type=jnp.float32)
             + b_post_ref[...])
        out_ref[...] = (z * jax.nn.sigmoid(z)).astype(out_ref.dtype)


def _vmem_limit_bytes():
    """Generation-aware VMEM budget: ~100 MiB on v5e/v6e, ~56 MiB on v7x."""
    try:
        phys = int(pltpu.get_tpu_info().vmem_capacity_bytes)
    except Exception:
        phys = 64 * 1024 * 1024      # conservative fallback (v7x-sized)
    return int(min(phys - 8 * 1024 * 1024, 100 * 1024 * 1024))


def cfconv_fused(x, edge_basis, src, dst, params, *, edge_tile=256):
    """Pallas-backed CFConvFused forward.

    x:          [N, d_in] f32
    edge_basis: [E, d_radial] f32
    src, dst:   [E] int32 edge endpoints
    params:     dict of weights/biases (see init_params)
    """
    n, d_in = x.shape
    e, d_rad = edge_basis.shape
    d_hidden = params["w_pre"].shape[1]
    d_out = params["w_post"].shape[1]

    # Padded, hardware-friendly sizes: lanes -> 128, f32 sublanes -> 8.
    n_p = _round_up(n, 8)
    e_p = _round_up(max(e, 1), edge_tile)
    d_rad_p = _round_up(d_rad, 128)
    h_p = _round_up(d_hidden, 128)
    d_out_p = _round_up(d_out, 128)

    f32, bf16 = jnp.float32, jnp.bfloat16

    # Pre-linear hoisted out of the kernel (suggestion P9 in the review):
    # computed once in XLA, padded, and handed to the kernel as a resident bf16
    # input.  Removes the j==0 serial bubble and the x/W_pre/b_pre VMEM footprint.
    hv = x.astype(f32) @ params["w_pre"] + params["b_pre"]        # [N, H] f32
    hv_p = jnp.zeros((n_p, h_p), bf16).at[:n, :d_hidden].set(hv.astype(bf16))

    eb_p = jnp.zeros((e_p, d_rad_p), bf16).at[:e, :d_rad].set(edge_basis.astype(bf16))
    # Padded edges get id -1 -> never match any node id in the kernel.
    src_p = jnp.full((e_p, 1), -1, jnp.int32).at[:e, 0].set(src.astype(jnp.int32))
    dst_p = jnp.full((1, e_p), -1, jnp.int32).at[0, :e].set(dst.astype(jnp.int32))

    w_rad = jnp.zeros((d_rad_p, h_p), bf16).at[:d_rad, :d_hidden].set(
        params["w_rad"].astype(bf16))
    b_rad = jnp.zeros((1, h_p), f32).at[:, :d_hidden].set(params["b_rad"])
    w_post = jnp.zeros((h_p, d_out_p), bf16).at[:d_hidden, :d_out].set(
        params["w_post"].astype(bf16))
    b_post = jnp.zeros((1, d_out_p), f32).at[:, :d_out].set(params["b_post"])

    num_e_tiles = e_p // edge_tile

    # Advisory cost estimate for XLA's scheduler (kernel-side work only).
    flops = 2 * (e_p * d_rad_p * h_p          # radial linear
                 + 2 * e_p * n_p * h_p        # gather + scatter matmuls
                 + n_p * h_p * d_out_p)       # post linear
    bytes_accessed = (2 * (hv_p.size + eb_p.size + w_rad.size + w_post.size)
                      + 4 * (src_p.size + dst_p.size + b_rad.size + b_post.size
                             + n_p * d_out_p))

    out_p = pl.pallas_call(
        cfconv_kernel,
        out_shape=jax.ShapeDtypeStruct((n_p, d_out_p), f32),
        grid_spec=pltpu.PrefetchScalarGridSpec(
            num_scalar_prefetch=0,
            grid=(num_e_tiles,),
            in_specs=[
                pl.BlockSpec((n_p, h_p), lambda j: (0, 0)),            # hv (resident)
                pl.BlockSpec((edge_tile, d_rad_p), lambda j: (j, 0)),  # edge_basis tile
                pl.BlockSpec((edge_tile, 1), lambda j: (j, 0)),        # src ids (column)
                pl.BlockSpec((1, edge_tile), lambda j: (0, j)),        # dst ids (row)
                pl.BlockSpec((d_rad_p, h_p), lambda j: (0, 0)),        # w_rad
                pl.BlockSpec((1, h_p), lambda j: (0, 0)),              # b_rad
                pl.BlockSpec((h_p, d_out_p), lambda j: (0, 0)),        # w_post
                pl.BlockSpec((1, d_out_p), lambda j: (0, 0)),          # b_post
            ],
            out_specs=pl.BlockSpec((n_p, d_out_p), lambda j: (0, 0)),
            scratch_shapes=[
                pltpu.VMEM((n_p, h_p), f32),   # acc (scatter accumulator, f32)
            ],
        ),
        compiler_params=pltpu.CompilerParams(
            # Edge axis is a reduction into the resident node accumulator.
            dimension_semantics=("arbitrary",),
            vmem_limit_bytes=_vmem_limit_bytes(),
        ),
        cost_estimate=pl.CostEstimate(
            flops=int(flops),
            transcendentals=int(n_p * d_out_p),
            bytes_accessed=int(bytes_accessed),
        ),
    )(hv_p, eb_p, src_p, dst_p, w_rad, b_rad, w_post, b_post)

    return out_p[:n, :d_out]


def init_params(key, d_in, d_radial, d_hidden, d_out):
    ks = jax.random.split(key, 6)
    scale = 0.1
    return {
        # stored as [in, out] so the forward computes x @ W + b
        "w_pre": scale * jax.random.normal(ks[0], (d_in, d_hidden), jnp.float32),
        "b_pre": scale * jax.random.normal(ks[1], (1, d_hidden), jnp.float32),
        "w_rad": scale * jax.random.normal(ks[2], (d_radial, d_hidden), jnp.float32),
        "b_rad": scale * jax.random.normal(ks[3], (1, d_hidden), jnp.float32),
        "w_post": scale * jax.random.normal(ks[4], (d_hidden, d_out), jnp.float32),
        "b_post": scale * jax.random.normal(ks[5], (1, d_out), jnp.float32),
    }


def cfconv_reference(x, edge_basis, src, dst, params):
    """Pure-JAX f32 reference mirroring the PyTorch/DGL semantics."""
    hv = x @ params["w_pre"] + params["b_pre"]                  # [N, H]
    filt = edge_basis @ params["w_rad"] + params["b_rad"]       # [E, H]
    m = hv[src] * filt                                          # [E, H]
    h = jnp.zeros((x.shape[0], hv.shape[1]), jnp.float32).at[dst].add(m)
    z = h @ params["w_post"] + params["b_post"]
    return z * jax.nn.sigmoid(z)


if __name__ == "__main__":
    # Small synthetic graph: N nodes, E directed edges (more than one edge tile
    # so the cross-tile accumulation path is exercised).
    N, E = 12, 300
    d_in, d_radial, d_hidden = 16, 8, 32
    d_out = d_in  # matches d_out=None default in the module

    key = jax.random.PRNGKey(0)
    k_x, k_eb, k_src, k_dst, k_par = jax.random.split(key, 5)

    x = jax.random.normal(k_x, (N, d_in), jnp.float32)
    edge_basis = jax.random.normal(k_eb, (E, d_radial), jnp.float32)
    src = jax.random.randint(k_src, (E,), 0, N, jnp.int32)
    dst = jax.random.randint(k_dst, (E,), 0, N, jnp.int32)

    params = init_params(k_par, d_in, d_radial, d_hidden, d_out)

    out = cfconv_fused(x, edge_basis, src, dst, params)
    out = jax.block_until_ready(out)

    ref = cfconv_reference(x, edge_basis, src, dst, params)
    assert out.shape == (N, d_out)
    max_err = float(jnp.max(jnp.abs(out - ref)))
    # bf16 MXU operands (f32 accumulation) -> looser tolerance than a pure-f32 run.
    assert jnp.allclose(out, ref, atol=5e-2, rtol=5e-2), (
        f"mismatch vs reference (max abs err {max_err})")

    print("KERNEL_OK")
</pallas_src>

<mosaic_0001>
module attributes {stable_mosaic.version = 11 : i64} {
  func.func @cfconv_kernel(%arg0: i32, %arg1: memref<16x128xbf16, #tpu.memory_space<vmem>>, %arg2: memref<256x128xbf16, #tpu.memory_space<vmem>>, %arg3: memref<256x1xi32, #tpu.memory_space<vmem>>, %arg4: memref<1x256xi32, #tpu.memory_space<vmem>>, %arg5: memref<128x128xbf16, #tpu.memory_space<vmem>>, %arg6: memref<1x128xf32, #tpu.memory_space<vmem>>, %arg7: memref<128x128xbf16, #tpu.memory_space<vmem>>, %arg8: memref<1x128xf32, #tpu.memory_space<vmem>>, %arg9: memref<16x128xf32, #tpu.memory_space<vmem>>, %arg10: memref<16x128xf32, #tpu.memory_space<vmem>>) attributes {dimension_semantics = [#tpu.dimension_semantics<arbitrary>], iteration_bounds = array<i64: 2>, scalar_prefetch = 0 : i64, scratch_operands = 1 : i64, tpu.core_type = #tpu.core_type<tc>, window_params = [{pipeline_mode = #tpu.pipeline_mode<synchronous>, transform_indices = @transform_0, window_bounds = array<i64: 16, 128>}, {transform_indices = @transform_1, window_bounds = array<i64: 256, 128>}, {transform_indices = @transform_2, window_bounds = array<i64: 256, 1>}, {transform_indices = @transform_3, window_bounds = array<i64: 1, 256>}, {pipeline_mode = #tpu.pipeline_mode<synchronous>, transform_indices = @transform_4, window_bounds = array<i64: 128, 128>}, {pipeline_mode = #tpu.pipeline_mode<synchronous>, transform_indices = @transform_5, window_bounds = array<i64: 1, 128>}, {pipeline_mode = #tpu.pipeline_mode<synchronous>, transform_indices = @transform_6, window_bounds = array<i64: 128, 128>}, {pipeline_mode = #tpu.pipeline_mode<synchronous>, transform_indices = @transform_7, window_bounds = array<i64: 1, 128>}, {pipeline_mode = #tpu.pipeline_mode<synchronous>, transform_indices = @transform_8, window_bounds = array<i64: 16, 128>}]} {
    %c0_i32 = arith.constant 0 : i32
    %0 = arith.cmpi eq, %arg0, %c0_i32 : i32
    %1 = arith.extui %0 : i1 to i32
    %c0_i32_0 = arith.constant 0 : i32
    %2 = arith.cmpi ne, %1, %c0_i32_0 : i32
    scf.if %2 {
      %cst_19 = arith.constant 0.000000e+00 : f32
      %34 = vector.broadcast %cst_19 : f32 to vector<16x128xf32>
      %c0_20 = arith.constant 0 : index
      %c0_21 = arith.constant 0 : index
      %35 = vector.load %arg10[%c0_20, %c0_21] : memref<16x128xf32, #tpu.memory_space<vmem>>, vector<16x128xf32>
      tpu.vector_store %arg10[%c0_20, %c0_21], %34 {strides = array<i32>} : memref<16x128xf32, #tpu.memory_space<vmem>>, vector<16x128xf32>,
    } else {
    }
    %c0 = arith.constant 0 : index
    %c0_1 = arith.constant 0 : index
    %3 = vector.load %arg2[%c0, %c0_1] : memref<256x128xbf16, #tpu.memory_space<vmem>>, vector<256x128xbf16>
    %c0_2 = arith.constant 0 : index
    %c0_3 = arith.constant 0 : index
    %4 = vector.load %arg5[%c0_2, %c0_3] : memref<128x128xbf16, #tpu.memory_space<vmem>>, vector<128x128xbf16>
    %cst = arith.constant dense<0.000000e+00> : vector<256x128xf32>
    %5 = tpu.matmul %3, %4, %cst {dimension_numbers = #tpu.dot_dimension_numbers<[1], [0], [0], [1], [0, 0, 1, 1], [], []>} : vector<256x128xbf16>, vector<128x128xbf16>, vector<256x128xf32> -> vector<256x128xf32>
    %c0_4 = arith.constant 0 : index
    %c0_5 = arith.constant 0 : index
    %6 = vector.load %arg6[%c0_4, %c0_5] : memref<1x128xf32, #tpu.memory_space<vmem>>, vector<1x128xf32>
    %7 = vector.broadcast %6 : vector<1x128xf32> to vector<256x128xf32>
    %8 = arith.addf %5, %7 : vector<256x128xf32>
    %9 = tpu.iota {dimensions = array<i32: 1>} : vector<256x16xi32>
    %c0_6 = arith.constant 0 : index
    %c0_7 = arith.constant 0 : index
    %10 = vector.load %arg3[%c0_6, %c0_7] : memref<256x1xi32, #tpu.memory_space<vmem>>, vector<256x1xi32>
    %11 = vector.broadcast %10 : vector<256x1xi32> to vector<256x16xi32>
    %12 = arith.cmpi eq, %11, %9 : vector<256x16xi32>
    %13 = arith.extui %12 : vector<256x16xi1> to vector<256x16xi32>
    %14 = arith.sitofp %13 : vector<256x16xi32> to vector<256x16xf32>
    %15 = arith.truncf %14 : vector<256x16xf32> to vector<256x16xbf16>
    %16 = tpu.iota {dimensions = array<i32: 0>} : vector<16x256xi32>
    %c0_8 = arith.constant 0 : index
    %c0_9 = arith.constant 0 : index
    %17 = vector.load %arg4[%c0_8, %c0_9] : memref<1x256xi32, #tpu.memory_space<vmem>>, vector<1x256xi32>
    %18 = vector.broadcast %17 : vector<1x256xi32> to vector<16x256xi32>
    %19 = arith.cmpi eq, %18, %16 : vector<16x256xi32>
    %20 = arith.extui %19 : vector<16x256xi1> to vector<16x256xi32>
    %21 = arith.sitofp %20 : vector<16x256xi32> to vector<16x256xf32>
    %22 = arith.truncf %21 : vector<16x256xf32> to vector<16x256xbf16>
    %c0_10 = arith.constant 0 : index
    %c0_11 = arith.constant 0 : index
    %23 = vector.load %arg1[%c0_10, %c0_11] : memref<16x128xbf16, #tpu.memory_space<vmem>>, vector<16x128xbf16>
    %cst_12 = arith.constant dense<0.000000e+00> : vector<256x128xf32>
    %24 = tpu.matmul %15, %23, %cst_12 {dimension_numbers = #tpu.dot_dimension_numbers<[1], [0], [0], [1], [0, 0, 1, 1], [], []>} : vector<256x16xbf16>, vector<16x128xbf16>, vector<256x128xf32> -> vector<256x128xf32>
    %25 = arith.mulf %24, %8 : vector<256x128xf32>
    %26 = arith.truncf %25 : vector<256x128xf32> to vector<256x128xbf16>
    %c0_13 = arith.constant 0 : index
    %c0_14 = arith.constant 0 : index
    %27 = vector.load %arg10[%c0_13, %c0_14] : memref<16x128xf32, #tpu.memory_space<vmem>>, vector<16x128xf32>
    %cst_15 = arith.constant dense<0.000000e+00> : vector<16x128xf32>
    %28 = tpu.matmul %22, %26, %cst_15 {dimension_numbers = #tpu.dot_dimension_numbers<[1], [0], [0], [1], [0, 0, 1, 1], [], []>} : vector<16x256xbf16>, vector<256x128xbf16>, vector<16x128xf32> -> vector<16x128xf32>
    %29 = arith.addf %27, %28 : vector<16x128xf32>
    %c0_16 = arith.constant 0 : index
    %c0_17 = arith.constant 0 : index
    %30 = vector.load %arg10[%c0_16, %c0_17] : memref<16x128xf32, #tpu.memory_space<vmem>>, vector<16x128xf32>
    tpu.vector_store %arg10[%c0_16, %c0_17], %29 {strides = array<i32>} : memref<16x128xf32, #tpu.memory_space<vmem>>, vector<16x128xf32>,
    %c1_i32 = arith.constant 1 : i32
    %31 = arith.cmpi eq, %arg0, %c1_i32 : i32
    %32 = arith.extui %31 : i1 to i32
    %c0_i32_18 = arith.constant 0 : i32
    %33 = arith.cmpi ne, %32, %c0_i32_18 : i32
    scf.if %33 {
      %c0_19 = arith.constant 0 : index
      %c0_20 = arith.constant 0 : index
      %34 = vector.load %arg10[%c0_19, %c0_20] : memref<16x128xf32, #tpu.memory_space<vmem>>, vector<16x128xf32>
      %35 = arith.truncf %34 : vector<16x128xf32> to vector<16x128xbf16>
      %c0_21 = arith.constant 0 : index
      %c0_22 = arith.constant 0 : index
      %36 = vector.load %arg7[%c0_21, %c0_22] : memref<128x128xbf16, #tpu.memory_space<vmem>>, vector<128x128xbf16>
      %cst_23 = arith.constant dense<0.000000e+00> : vector<16x128xf32>
      %37 = tpu.matmul %35, %36, %cst_23 {dimension_numbers = #tpu.dot_dimension_numbers<[1], [0], [0], [1], [0, 0, 1, 1], [], []>} : vector<16x128xbf16>, vector<128x128xbf16>, vector<16x128xf32> -> vector<16x128xf32>
      %c0_24 = arith.constant 0 : index
      %c0_25 = arith.constant 0 : index
      %38 = vector.load %arg8[%c0_24, %c0_25] : memref<1x128xf32, #tpu.memory_space<vmem>>, vector<1x128xf32>
      %39 = vector.broadcast %38 : vector<1x128xf32> to vector<16x128xf32>
      %40 = arith.addf %37, %39 : vector<16x128xf32>
      %41 = arith.negf %40 : vector<16x128xf32>
      %42 = math.exp %41 : vector<16x128xf32>
      %cst_26 = arith.constant 1.000000e+00 : f32
      %43 = vector.broadcast %cst_26 : f32 to vector<16x128xf32>
      %44 = arith.addf %43, %42 : vector<16x128xf32>
      %45 = arith.divf %43, %44 : vector<16x128xf32>
      %46 = arith.mulf %40, %45 : vector<16x128xf32>
      %c0_27 = arith.constant 0 : index
      %c0_28 = arith.constant 0 : index
      %47 = vector.load %arg9[%c0_27, %c0_28] : memref<16x128xf32, #tpu.memory_space<vmem>>, vector<16x128xf32>
      tpu.vector_store %arg9[%c0_27, %c0_28], %46 {strides = array<i32>} : memref<16x128xf32, #tpu.memory_space<vmem>>, vector<16x128xf32>,
    } else {
    }
    return
  }
  func.func @transform_0(%arg0: i32) -> (i32, i32) {
    %c0_i32 = arith.constant 0 : i32
    %c0_i32_0 = arith.constant 0 : i32
    %c0_i32_1 = arith.constant 0 : i32
    return %c0_i32, %c0_i32_0 : i32, i32
  }
  func.func @transform_1(%arg0: i32) -> (i32, i32) {
    %c0_i32 = arith.constant 0 : i32
    %c0_i32_0 = arith.constant 0 : i32
    return %arg0, %c0_i32 : i32, i32
  }
  func.func @transform_2(%arg0: i32) -> (i32, i32) {
    %c0_i32 = arith.constant 0 : i32
    %c0_i32_0 = arith.constant 0 : i32
    return %arg0, %c0_i32 : i32, i32
  }
  func.func @transform_3(%arg0: i32) -> (i32, i32) {
    %c0_i32 = arith.constant 0 : i32
    %c0_i32_0 = arith.constant 0 : i32
    return %c0_i32, %arg0 : i32, i32
  }
  func.func @transform_4(%arg0: i32) -> (i32, i32) {
    %c0_i32 = arith.constant 0 : i32
    %c0_i32_0 = arith.constant 0 : i32
    %c0_i32_1 = arith.constant 0 : i32
    return %c0_i32, %c0_i32_0 : i32, i32
  }
  func.func @transform_5(%arg0: i32) -> (i32, i32) {
    %c0_i32 = arith.constant 0 : i32
    %c0_i32_0 = arith.constant 0 : i32
    %c0_i32_1 = arith.constant 0 : i32
    return %c0_i32, %c0_i32_0 : i32, i32
  }
  func.func @transform_6(%arg0: i32) -> (i32, i32) {
    %c0_i32 = arith.constant 0 : i32
    %c0_i32_0 = arith.constant 0 : i32
    %c0_i32_1 = arith.constant 0 : i32
    return %c0_i32, %c0_i32_0 : i32, i32
  }
  func.func @transform_7(%arg0: i32) -> (i32, i32) {
    %c0_i32 = arith.constant 0 : i32
    %c0_i32_0 = arith.constant 0 : i32
    %c0_i32_1 = arith.constant 0 : i32
    return %c0_i32, %c0_i32_0 : i32, i32
  }
  func.func @transform_8(%arg0: i32) -> (i32, i32) {
    %c0_i32 = arith.constant 0 : i32
    %c0_i32_0 = arith.constant 0 : i32
    %c0_i32_1 = arith.constant 0 : i32
    return %c0_i32, %c0_i32_0 : i32, i32
  }
}

</mosaic_0001>

<bundles_post_ra>
// kernel: tpu_custom_call.1
= control target key start
LH: loop header
LB: loop body
LE: loop exit
PB: predicated region body
PF: predicated region fallthrough
CT: control target
= control target key end

     0   :  { %13 = vsyncpa [#allocation4], 0  ;;  %s1692_s27 = smov 0   ;;  %s2029_s0 = inlined_call_operand.vmem [shape: bf16[16,128], index: 0, kind: input, shape index: {}]   ;;  %s2030_s1 = inlined_call_operand.vmem [shape: bf16[512,128], index: 1, kind: input, shape index: {}]   ;;  %s2031_s2 = inlined_call_operand.vmem [shape: s32[512,1], index: 2, kind: input, shape index: {}]   ;;  %s2032_s3 = inlined_call_operand.vmem [shape: s32[1,512], index: 3, kind: input, shape index: {}]   ;;  %s2033_s4 = inlined_call_operand.vmem [shape: bf16[128,128], index: 4, kind: input, shape index: {}]   ;;  %s2034_s5 = inlined_call_operand.vmem [shape: f32[1,128], index: 5, kind: input, shape index: {}]   ;;  %s2035_s6 = inlined_call_operand.vmem [shape: bf16[128,128], index: 6, kind: input, shape index: {}]   ;;  %s2036_s7 = inlined_call_operand.vmem [shape: f32[1,128], index: 7, kind: input, shape index: {}]   ;;  %s2037_s8 = inlined_call_operand.hbm [shape: f32[16,128], index: 8, kind: output, shape index: {}]  }
   0x1 LB: > { %s1698_s28 = sadd.s32 4294967295, %s1638_s27   ;;  %p1322_p0 = scmp.ge.s32.totalorder %s1638_s27, 1  ;;  %s1638_s27 = sphi %s1692_s27, %s19_s27  }
   0x2   : > { %p280_p1 = scmp.lt.s32.totalorder %s1638_s27, 3 }
   0x4   : > { %p281_p2 = pnand %p1322_p0, %p280_p1 }
   0x5   : > { %s1323_s29 = sshll.u32 (!%p281_p2), %s1698_s28, 5  ;;  %s1327_s30 = sshll.u32 (!%p281_p2), %s1698_s28, 1 }
   0x6   : > { %284 = sbr.rel (%p281_p2) target bundleno = 791 (0x317), region = 52  ;;  %p319_p3 = scmp.lt.s32.totalorder (!%p281_p2), %s1323_s29, 63 }
   0x7   : > { %p331_p4 = scmp.lt.s32.totalorder (!%p281_p2), %s1327_s30, 3  ;;  %p1328_p5 = scmp.ne.s32.totalorder (!%p281_p2), %s1698_s28, 0 }
   0xb   : > { %s2041_s29 = smov (!%p319_p3, %s1323_s29), 63  ;;  %s2043_s30 = smov (!%p331_p4, %s1327_s30), 3 }
   0xc   : > { %s1324_s9 = sshll.u32 %s2041_s29, 2  ;;  %s1326_s10 = sshll.u32 %s2041_s29, 3 }
   0xd   : > { %s1709_s13 = scalar_lea.vmem %s2030_s1, %s1324_s9  ;;  %s1714_s16 = scalar_lea.vmem %s2031_s2, %s1326_s10 }
   0xe   : > { %s333_s19 = scalar_lea.vmem %s2032_s3, %s2043_s30  ;;  %339 = sbr.rel (%p1328_p5) target bundleno = 22 (0x16), region = 56 }
  0x13   : > { %v1640_v0 = vmov 0.0  }
  0x14   : > { %340 = vst [vmem:[#allocation2] sm:$0xff] %v1640_v0 }
  0x15   : > { %341 = vst [vmem:[#allocation2 + $0x8] sm:$0xff] %v1640_v0 }
  0x16 PF: > { %v633_v1 = vld [vmem:[%s1714_s16 + $0x20] sm:$0xff]  ;;  %v631_v2 = vld [vmem:[%s1714_s16 + $0x10] sm:$0xff]  ;;  %v1641_v4 = vmov 0   ;;  %v634_v5 = vld [vmem:[%s1714_s16 + $0x28] sm:$0xff]  ;;  %v627_v48 = vlaneseq  ;;  %v1642_v57 = vmov 0.0   ;;  %vm897_vm2 = vcmask 130048  }
  0x17   : > { %v629_v3 = vld [vmem:[%s1714_s16] sm:$0xff]  ;;  %1589 = vset.pattern.permute.xlu2 %v1641_v4  ;;  %1588 = vset.pattern.permute.xlu1 %v1641_v4  ;;  %v632_v6 = vld [vmem:[%s1714_s16 + $0x18] sm:$0xff]  ;;  %v630_v7 = vld [vmem:[%s1714_s16 + $0x8] sm:$0xff]  ;;  %p1485_p6 = scmp.ne.s32.totalorder %s1698_s28, 1 }
  0x18   : > { %1587 = vset.pattern.permute.xlu0 %v1641_v4  ;;  %674 = vperm.xlu2 %1589, %v633_v1   ;;  %v635_v8 = vld [vmem:[%s1714_s16 + $0x30] sm:$0xff]  ;;  %v650_v9 = vld [vmem:[%s1714_s16 + $0xa8] sm:$0xff]  ;;  %v649_v10 = vld [vmem:[%s1714_s16 + $0xa0] sm:$0xff]  ;;  %v1786_v52 = vand.u32 127, %v627_v48 }
  0x19   : > { %668 = vperm.xlu1 %1588, %v631_v2   ;;  %662 = vperm.xlu0 %1587, %v629_v3   ;;  %v652_v11 = vld [vmem:[%s1714_s16 + $0xb8] sm:$0xff]  ;;  %v651_v12 = vld [vmem:[%s1714_s16 + $0xb0] sm:$0xff]  ;;  %v653_v14 = vld [vmem:[%s1714_s16 + $0xc0] sm:$0xff] }
  0x1a   : > { %v636_v13 = vld [vmem:[%s1714_s16 + $0x38] sm:$0xff]  ;;  %v638_v15 = vld [vmem:[%s1714_s16 + $0x48] sm:$0xff]  ;;  %v637_v16 = vld [vmem:[%s1714_s16 + $0x40] sm:$0xff] }
  0x1b   : > { %v640_v17 = vld [vmem:[%s1714_s16 + $0x58] sm:$0xff]  ;;  %v639_v18 = vld [vmem:[%s1714_s16 + $0x50] sm:$0xff]  ;;  %v654_v19 = vld [vmem:[%s1714_s16 + $0xc8] sm:$0xff] }
  0x1c   : > { %v641_v20 = vld [vmem:[%s1714_s16 + $0x60] sm:$0xff]  ;;  %v656_v21 = vld [vmem:[%s1714_s16 + $0xd8] sm:$0xff]  ;;  %v655_v22 = vld [vmem:[%s1714_s16 + $0xd0] sm:$0xff] }
  0x1d   : > { %v1547_v23 = vld [vmem:[%s2033_s4 + $0x38] sm:$0xff]  ;;  %v658_v24 = vld [vmem:[%s1714_s16 + $0xe8] sm:$0xff]  ;;  %v657_v25 = vld [vmem:[%s1714_s16 + $0xe0] sm:$0xff] }
  0x1e   : > { %538 = vmatpush.bf16.msra.mxu0 %v1547_v23  ;;  %1557 = vmatpush.bf16.msra.mxu2 %v1547_v23  ;;  %v642_v26 = vld [vmem:[%s1714_s16 + $0x68] sm:$0xff]  ;;  %v1546_v27 = vld [vmem:[%s2033_s4 + $0x30] sm:$0xff]  ;;  %v644_v30 = vld [vmem:[%s1714_s16 + $0x78] sm:$0xff] }
  0x1f   : > { %v1545_v28 = vld [vmem:[%s2033_s4 + $0x28] sm:$0xff]  ;;  %v659_v29 = vld [vmem:[%s1714_s16 + $0xf0] sm:$0xff]  ;;  %v1544_v32 = vld [vmem:[%s2033_s4 + $0x20] sm:$0xff] }
  0x20   : > { %677 = vperm.xlu2 %1589, %v634_v5   ;;  %v643_v31 = vld [vmem:[%s1714_s16 + $0x70] sm:$0xff]  ;;  %v646_v33 = vld [vmem:[%s1714_s16 + $0x88] sm:$0xff]  ;;  %v1543_v34 = vld [vmem:[%s2033_s4 + $0x18] sm:$0xff] }
  0x21   : > { %671 = vperm.xlu1 %1588, %v632_v6   ;;  %665 = vperm.xlu0 %1587, %v630_v7   ;;  %v645_v35 = vld [vmem:[%s1714_s16 + $0x80] sm:$0xff]  ;;  %v660_v36 = vld [vmem:[%s1714_s16 + $0xf8] sm:$0xff]  ;;  %v1542_v37 = vld [vmem:[%s2033_s4 + $0x10] sm:$0xff] }
  0x22   : > { %539 = vmatpush.bf16.msra.mxu0 %v1546_v27  ;;  %1558 = vmatpush.bf16.msra.mxu2 %v1546_v27  ;;  %v1541_v38 = vld [vmem:[%s2033_s4 + $0x8] sm:$0xff]  ;;  %v648_v39 = vld [vmem:[%s1714_s16 + $0x98] sm:$0xff]  ;;  %v647_v40 = vld [vmem:[%s1714_s16 + $0x90] sm:$0xff] }
  0x23   : > { %v1540_v41 = vld [vmem:[%s2033_s4] sm:$0xff]  ;;  %v1533_v42 = vld [vmem:[%s1709_s13 + $0x48] sm:$0xff]  ;;  %v1534_v45 = vld [vmem:[%s1709_s13 + $0x50] sm:$0xff] }
  0x24   : > { %v1524_v43 = vld [vmem:[%s1709_s13] sm:$0xff]  ;;  %v1525_v46 = vld [vmem:[%s1709_s13 + $0x8] sm:$0xff]  ;;  %v1535_v51 = vld [vmem:[%s1709_s13 + $0x58] sm:$0xff] }
  0x25   : > { %v1548_v44 = vld [vmem:[%s2029_s0] sm:$0xff]  ;;  %v1526_v53 = vld [vmem:[%s1709_s13 + $0x10] sm:$0xff]  ;;  %v1527_v4 = vld [vmem:[%s1709_s13 + $0x18] sm:$0xff] }
  0x26   : > { %540 = vmatpush.bf16.msra.mxu0 %v1545_v28  ;;  %1559 = vmatpush.bf16.msra.mxu2 %v1545_v28  ;;  %v1536_v63 = vld [vmem:[%s1709_s13 + $0x60] sm:$0xff]  ;;  %v1529_v28 = vld [vmem:[%s1709_s13 + $0x28] sm:$0xff] }
  0x27   : > { %953 = vmatpush.bf16.msra.mxu1 %v1548_v44  ;;  %1565 = vmatpush.bf16.msra.mxu3 %v1548_v44 }
  0x28   : > { %680 = vperm.xlu2 %1589, %v635_v8  }
  0x29   : > { %725 = vperm.xlu1 %1588, %v650_v9   ;;  %722 = vperm.xlu0 %1587, %v649_v10  }
  0x2a   : > { %541 = vmatpush.bf16.msra.mxu0 %v1544_v32  ;;  %1560 = vmatpush.bf16.msra.mxu2 %v1544_v32 }
  0x2e   : > { %542 = vmatpush.bf16.msra.mxu0 %v1543_v34  ;;  %1561 = vmatpush.bf16.msra.mxu2 %v1543_v34 }
  0x30   : > { %731 = vperm.xlu2 %1589, %v652_v11  }
  0x31   : > { %728 = vperm.xlu1 %1588, %v651_v12   ;;  %683 = vperm.xlu0 %1587, %v636_v13  }
  0x32   : > { %543 = vmatpush.bf16.msra.mxu0 %v1542_v37  ;;  %1562 = vmatpush.bf16.msra.mxu2 %v1542_v37 }
  0x36   : > { %544 = vmatpush.bf16.msra.mxu0 %v1541_v38  ;;  %1563 = vmatpush.bf16.msra.mxu2 %v1541_v38  ;;  %v1530_v38 = vld [vmem:[%s1709_s13 + $0x30] sm:$0xff] }
  0x38   : > { %734 = vperm.xlu2 %1589, %v653_v14   ;;  %v1537_v14 = vld [vmem:[%s1709_s13 + $0x68] sm:$0xff] }
  0x39   : > { %689 = vperm.xlu1 %1588, %v638_v15   ;;  %686 = vperm.xlu0 %1587, %v637_v16   ;;  %v1528_v16 = vld [vmem:[%s1709_s13 + $0x20] sm:$0xff] }
  0x3a   : > { %545 = vmatpush.bf16.msra.mxu0 %v1540_v41  ;;  %1564 = vmatpush.bf16.msra.mxu2 %v1540_v41 }
  0x3d   : > { %591 = vmatmul.bf16.vlgmr.msra.gmra.mxu2 %v1533_v42  ;;  %546 = vmatmul.bf16.vlgmr.msra.gmra.mxu0 %v1524_v43 }
  0x40   : > { %695 = vperm.xlu2 %1589, %v640_v17  }
  0x41   : > { %692 = vperm.xlu1 %1588, %v639_v18   ;;  %737 = vperm.xlu0 %1587, %v654_v19  }
  0x48   : > { %698 = vperm.xlu2 %1589, %v641_v20  }
  0x49   : > { %743 = vperm.xlu1 %1588, %v656_v21   ;;  %740 = vperm.xlu0 %1587, %v655_v22  }
  0x4d   : > { %596 = vmatmul.bf16.gmra.mxu2 %v1534_v45  ;;  %551 = vmatmul.bf16.gmra.mxu0 %v1525_v46 }
  0x50   : > { %749 = vperm.xlu2 %1589, %v658_v24  }
  0x51   : > { %746 = vperm.xlu1 %1588, %v657_v25   ;;  %701 = vperm.xlu0 %1587, %v642_v26   ;;  %v1538_v25 = vld [vmem:[%s1709_s13 + $0x70] sm:$0xff] }
  0x58   : > { %752 = vperm.xlu2 %1589, %v659_v29  }
  0x59   : > { %707 = vperm.xlu1 %1588, %v644_v30   ;;  %704 = vperm.xlu0 %1587, %v643_v31  }
  0x5d   : > { %601 = vmatmul.bf16.gmra.mxu2 %v1535_v51  ;;  %556 = vmatmul.bf16.gmra.mxu0 %v1526_v53 }
  0x60   : > { %713 = vperm.xlu2 %1589, %v646_v33  }
  0x61   : > { %710 = vperm.xlu1 %1588, %v645_v35   ;;  %755 = vperm.xlu0 %1587, %v660_v36   ;;  %v1539_v35 = vld [vmem:[%s1709_s13 + $0x78] sm:$0xff] }
  0x69   : > { %719 = vperm.xlu1 %1588, %v648_v39   ;;  %716 = vperm.xlu0 %1587, %v647_v40  }
  0x6d   : > { %606 = vmatmul.bf16.gmra.mxu2 %v1536_v63  ;;  %561 = vmatmul.bf16.gmra.mxu0 %v1527_v4 }
  0x72   : > { %v675_v47 = vpop.permute.xlu2 %674 }
  0x73   : > { %vm761_vm9 = vcmp.eq.s32.totalorder %v675_v47, %v1786_v52 }
  0x74   : > { %v1429_v18 = vsel %vm761_vm9, 1.0, %v1642_v57 }
  0x7a   : > { %v678_v54 = vpop.permute.xlu2 %677 }
  0x7b   : > { %vm762_vm10 = vcmp.eq.s32.totalorder %v678_v54, %v1786_v52 }
  0x7c   : > { %v1430_v19 = vsel %vm762_vm10, 1.0, %v1642_v57 }
  0x7d   : > { %611 = vmatmul.bf16.gmra.mxu2 %v1537_v14  ;;  %566 = vmatmul.bf16.gmra.mxu0 %v1528_v16  ;;  %v855_v21 = vpack.c.bf16 %v1430_v19, %v1429_v18  ;;  %v1876_v14 = vld [vmem:[%s2034_s5] ss:$0 sm:$0xff] }
  0x82   : > { %v681_v0 = vpop.permute.xlu2 %680 }
  0x83   : > { %vm763_vm13 = vcmp.eq.s32.totalorder %v681_v0, %v1786_v52 }
  0x84   : > { %v1431_v29 = vsel %vm763_vm13, 1.0, %v1642_v57 }
  0x8a   : > { %v732_v10 = vpop.permute.xlu2 %731 }
  0x8b   : > { %v669_v49 = vpop.permute.xlu1 %668  ;;  %v663_v50 = vpop.permute.xlu0 %662  ;;  %vm780_vm7 = vcmp.eq.s32.totalorder %v732_v10, %v1786_v52 }
  0x8c   : > { %vm757_vm0 = vcmp.eq.s32.totalorder %v663_v50, %v1786_v52  ;;  %vm759_vm5 = vcmp.eq.s32.totalorder %v669_v49, %v1786_v52  ;;  %v1448_v11 = vsel %vm780_vm7, 1.0, %v1642_v57  ;;  %v1531_v50 = vld [vmem:[%s1709_s13 + $0x38] sm:$0xff] }
  0x8d   : > { %v1425_v58 = vsel %vm757_vm0, 1.0, %v1642_v57  ;;  %v1427_v5 = vsel %vm759_vm5, 1.0, %v1642_v57  ;;  %616 = vmatmul.bf16.gmra.mxu2 %v1538_v25  ;;  %571 = vmatmul.bf16.gmra.mxu0 %v1529_v28 }
  0x92   : > { %v735_v22 = vpop.permute.xlu2 %734 }
  0x93   : > { %v672_v55 = vpop.permute.xlu1 %671  ;;  %v666_v56 = vpop.permute.xlu0 %665  ;;  %vm781_vm12 = vcmp.eq.s32.totalorder %v735_v22, %v1786_v52 }
  0x94   : > { %vm758_vm1 = vcmp.eq.s32.totalorder %v666_v56, %v1786_v52  ;;  %vm760_vm6 = vcmp.eq.s32.totalorder %v672_v55, %v1786_v52  ;;  %v1449_v26 = vsel %vm781_vm12, 1.0, %v1642_v57 }
  0x95   : > { %v1426_v59 = vsel %vm758_vm1, 1.0, %v1642_v57  ;;  %v1428_v6 = vsel %vm760_vm6, 1.0, %v1642_v57 }
  0x96   : > { %v853_v60 = vpack.c.bf16 %v1426_v59, %v1425_v58  ;;  %v854_v9 = vpack.c.bf16 %v1428_v6, %v1427_v5 }
  0x98   : > { %1465 = vmatmul.msk.bf16.vlgmr.msra.gmra.mxu1 %vm897_vm2, %v853_v60 }
  0x9a   : > { %v696_v30 = vpop.permute.xlu2 %695 }
  0x9b   : > { %v726_v61 = vpop.permute.xlu1 %725  ;;  %v723_v62 = vpop.permute.xlu0 %722  ;;  %vm768_vm7 = vcmp.eq.s32.totalorder %v696_v30, %v1786_v52 }
  0x9c   : > { %vm778_vm3 = vcmp.eq.s32.totalorder %v726_v61, %v1786_v52  ;;  %vm777_vm4 = vcmp.eq.s32.totalorder %v723_v62, %v1786_v52  ;;  %v1436_v55 = vsel %vm768_vm7, 1.0, %v1642_v57 }
  0x9d   : > { %v1446_v1 = vsel %vm778_vm3, 1.0, %v1642_v57  ;;  %v1445_v2 = vsel %vm777_vm4, 1.0, %v1642_v57  ;;  %621 = vmatmul.bf16.gmra.mxu2 %v1539_v35  ;;  %576 = vmatmul.bf16.gmra.mxu0 %v1530_v38 }
  0x9e   : > { %v863_v3 = vpack.c.bf16 %v1446_v1, %v1445_v2  ;;  %v1532_v2 = vld [vmem:[%s1709_s13 + $0x40] sm:$0xff] }
  0xa0   : > { %1475 = vmatmul.msk.bf16.vlgmr.msra.gmra.mxu3 %vm897_vm2, %v863_v3 }
  0xa2   : > { %v699_v39 = vpop.permute.xlu2 %698 }
  0xa3   : > { %v684_v7 = vpop.permute.xlu0 %683  ;;  %v729_v8 = vpop.permute.xlu1 %728 }
  0xa4   : > { %vm779_vm8 = vcmp.eq.s32.totalorder %v729_v8, %v1786_v52  ;;  %vm764_vm14 = vcmp.eq.s32.totalorder %v684_v7, %v1786_v52 }
  0xa5   : > { %v1447_v12 = vsel %vm779_vm8, 1.0, %v1642_v57  ;;  %v1432_v31 = vsel %vm764_vm14, 1.0, %v1642_v57 }
  0xa6   : > { %v864_v15 = vpack.c.bf16 %v1448_v11, %v1447_v12  ;;  %v856_v34 = vpack.c.bf16 %v1432_v31, %v1431_v29 }
  0xa8   : > { %1466 = vmatmul.msk.bf16.gmra.mxu1 %vm897_vm2, %v854_v9 }
  0xaa   : > { %v750_v46 = vpop.permute.xlu2 %749 }
  0xab   : > { %v687_v13 = vpop.permute.xlu0 %686  ;;  %v690_v17 = vpop.permute.xlu1 %689  ;;  %vm786_vm5 = vcmp.eq.s32.totalorder %v750_v46, %v1786_v52 }
  0xac   : > { %vm766_vm1 = vcmp.eq.s32.totalorder %v690_v17, %v1786_v52  ;;  %vm765_vm3 = vcmp.eq.s32.totalorder %v687_v13, %v1786_v52  ;;  %v1454_v51 = vsel %vm786_vm5, 1.0, %v1642_v57 }
  0xad   : > { %v1434_v42 = vsel %vm766_vm1, 1.0, %v1642_v57  ;;  %v1433_v43 = vsel %vm765_vm3, 1.0, %v1642_v57  ;;  %581 = vmatmul.bf16.gmra.mxu0 %v1531_v50 }
  0xae   : > { %v857_v45 = vpack.c.bf16 %v1434_v42, %v1433_v43 }
  0xb0   : > { %1476 = vmatmul.msk.bf16.gmra.mxu3 %vm897_vm2, %v864_v15 }
  0xb2   : > { %v753_v59 = vpop.permute.xlu2 %752 }
  0xb3   : > { %v738_v20 = vpop.permute.xlu0 %737  ;;  %v693_v23 = vpop.permute.xlu1 %692  ;;  %vm787_vm9 = vcmp.eq.s32.totalorder %v753_v59, %v1786_v52 }
  0xb4   : > { %vm782_vm11 = vcmp.eq.s32.totalorder %v738_v20, %v1786_v52  ;;  %vm767_vm6 = vcmp.eq.s32.totalorder %v693_v23, %v1786_v52  ;;  %v1455_v61 = vsel %vm787_vm9, 1.0, %v1642_v57 }
  0xb5   : > { %v1450_v24 = vsel %vm782_vm11, 1.0, %v1642_v57  ;;  %v1435_v54 = vsel %vm767_vm6, 1.0, %v1642_v57  ;;  %vm769_vm11 = vcmp.eq.s32.totalorder %v699_v39, %v1786_v52 }
  0xb6   : > { %v865_v27 = vpack.c.bf16 %v1450_v24, %v1449_v26  ;;  %v858_v58 = vpack.c.bf16 %v1436_v55, %v1435_v54  ;;  %v1437_v3 = vsel %vm769_vm11, 1.0, %v1642_v57 }
  0xb8   : > { %1467 = vmatmul.msk.bf16.gmra.mxu1 %vm897_vm2, %v855_v21 }
  0xba   : > { %v547_v63 = vpop.f32.mrf.mxu0  ;;  %v714_v15 = vpop.permute.xlu2 %713 }
  0xbb   : > { %v744_v32 = vpop.permute.xlu1 %743  ;;  %v741_v33 = vpop.permute.xlu0 %740  ;;  %v548_v18 = vadd.f32 %v1876_v14, %v547_v63 }
  0xbc   : > { %vm784_vm15 = vcmp.eq.s32.totalorder %v744_v32, %v1786_v52  ;;  %vm783_vm0 = vcmp.eq.s32.totalorder %v741_v33, %v1786_v52 }
  0xbd   : > { %v1452_v36 = vsel %vm784_vm15, 1.0, %v1642_v57  ;;  %v1451_v37 = vsel %vm783_vm0, 1.0, %v1642_v57  ;;  %586 = vmatmul.bf16.gmra.mxu0 %v1532_v2  ;;  %vm774_vm15 = vcmp.eq.s32.totalorder %v714_v15, %v1786_v52 }
  0xbe   : > { %v866_v40 = vpack.c.bf16 %v1452_v36, %v1451_v37  ;;  %v1442_v20 = vsel %vm774_vm15, 1.0, %v1642_v57 }
  0xc0   : > { %1477 = vmatmul.msk.bf16.gmra.mxu3 %vm897_vm2, %v865_v27  ;;  %v1861_v1 = vpop.f32.mrf.mxu2 }
  0xc2   : > { %v549_v5 = vpop.f32.mrf.mxu0 }
  0xc3   : > { %v702_v41 = vpop.permute.xlu0 %701  ;;  %v747_v44 = vpop.permute.xlu1 %746  ;;  %v550_v25 = vadd.f32 %v1876_v14, %v549_v5 }
  0xc4   : > { %vm785_vm4 = vcmp.eq.s32.totalorder %v747_v44, %v1786_v52  ;;  %vm770_vm10 = vcmp.eq.s32.totalorder %v702_v41, %v1786_v52 }
  0xc5   : > { %v1453_v47 = vsel %vm785_vm4, 1.0, %v1642_v57  ;;  %v1438_v0 = vsel %vm770_vm10, 1.0, %v1642_v57 }
  0xc6   : > { %v867_v53 = vpack.c.bf16 %v1454_v51, %v1453_v47  ;;  %v859_v4 = vpack.c.bf16 %v1438_v0, %v1437_v3 }
  0xc8   : > { %1468 = vmatmul.msk.bf16.gmra.mxu1 %vm897_vm2, %v856_v34  ;;  %v1866_v7 = vpop.f32.mrf.mxu2 }
  0xca   : > { %v552_v10 = vpop.f32.mrf.mxu0 }
  0xcb   : > { %v705_v49 = vpop.permute.xlu0 %704  ;;  %v708_v6 = vpop.permute.xlu1 %707  ;;  %v553_v33 = vadd.f32 %v1876_v14, %v552_v10 }
  0xcc   : > { %vm772_vm12 = vcmp.eq.s32.totalorder %v708_v6, %v1786_v52  ;;  %vm771_vm13 = vcmp.eq.s32.totalorder %v705_v49, %v1786_v52 }
  0xcd   : > { %v1440_v8 = vsel %vm772_vm12, 1.0, %v1642_v57  ;;  %v1439_v9 = vsel %vm771_vm13, 1.0, %v1642_v57 }
  0xce   : > { %v860_v11 = vpack.c.bf16 %v1440_v8, %v1439_v9 }
  0xd0   : > { %1478 = vmatmul.msk.bf16.gmra.mxu3 %vm897_vm2, %v866_v40  ;;  %v597_v12 = vpop.f32.mrf.mxu2 }
  0xd1   : > { %v598_v31 = vadd.f32 %v1876_v14, %v597_v12 }
  0xd2   : > { %v554_v16 = vpop.f32.mrf.mxu0 }
  0xd3   : > { %v756_v56 = vpop.permute.xlu0 %755  ;;  %v711_v13 = vpop.permute.xlu1 %710  ;;  %v555_v43 = vadd.f32 %v1876_v14, %v554_v16 }
  0xd4   : > { %vm788_vm8 = vcmp.eq.s32.totalorder %v756_v56, %v1786_v52  ;;  %vm773_vm14 = vcmp.eq.s32.totalorder %v711_v13, %v1786_v52 }
  0xd5   : > { %v1456_v60 = vsel %vm788_vm8, 1.0, %v1642_v57  ;;  %v1441_v19 = vsel %vm773_vm14, 1.0, %v1642_v57 }
  0xd6   : > { %v868_v62 = vpack.c.bf16 %v1456_v60, %v1455_v61  ;;  %v861_v22 = vpack.c.bf16 %v1442_v20, %v1441_v19 }
  0xd8   : > { %1469 = vmatmul.msk.bf16.gmra.mxu1 %vm897_vm2, %v857_v45  ;;  %v599_v17 = vpop.f32.mrf.mxu2 }
  0xda   : > { %v557_v24 = vpop.f32.mrf.mxu0 }
  0xdb   : > { %v720_v27 = vpop.permute.xlu1 %719  ;;  %v717_v28 = vpop.permute.xlu0 %716  ;;  %v558_v54 = vadd.f32 %v1876_v14, %v557_v24 }
  0xdc   : > { %vm776_vm0 = vcmp.eq.s32.totalorder %v720_v27, %v1786_v52  ;;  %vm775_vm1 = vcmp.eq.s32.totalorder %v717_v28, %v1786_v52  ;;  %v600_v52 = vadd.f32 %v1876_v14, %v599_v17 }
  0xdd   : > { %v1444_v34 = vsel %vm776_vm0, 1.0, %v1642_v57  ;;  %v1443_v35 = vsel %vm775_vm1, 1.0, %v1642_v57 }
  0xde   : > { %v862_v41 = vpack.c.bf16 %v1444_v34, %v1443_v35 }
  0xe0   : > { %1479 = vmatmul.msk.bf16.gmra.mxu3 %vm897_vm2, %v867_v53  ;;  %v602_v26 = vpop.f32.mrf.mxu2 }
  0xe1   : > { %v603_v51 = vadd.f32 %v1876_v14, %v602_v26 }
  0xe2   : > { %v559_v37 = vpop.f32.mrf.mxu0 }
  0xe3   : > { %v560_v63 = vadd.f32 %v1876_v14, %v559_v37 }
  0xe8   : > { %1470 = vmatmul.msk.bf16.gmra.mxu1 %vm897_vm2, %v858_v58  ;;  %v604_v40 = vpop.f32.mrf.mxu2 }
  0xe9   : > { %v605_v61 = vadd.f32 %v1876_v14, %v604_v40 }
  0xea   : > { %v562_v57 = vpop.f32.mrf.mxu0 }
  0xeb   : > { %v563_v10 = vadd.f32 %v1876_v14, %v562_v57 }
  0xf0   : > { %1480 = vmatmul.msk.bf16.gmra.mxu3 %vm897_vm2, %v868_v62  ;;  %v607_v50 = vpop.f32.mrf.mxu2 }
  0xf1   : > { %v608_v6 = vadd.f32 %v1876_v14, %v607_v50 }
  0xf2   : > { %v564_v60 = vpop.f32.mrf.mxu0 }
  0xf3   : > { %v565_v17 = vadd.f32 %v1876_v14, %v564_v60 }
  0xf8   : > { %1471 = vmatmul.msk.bf16.gmra.mxu1 %vm897_vm2, %v859_v4  ;;  %v609_v62 = vpop.f32.mrf.mxu2 }
  0xfa   : > { %v567_v9 = vpop.f32.mrf.mxu0 }
 0x100   : > { %v612_v12 = vpop.f32.mrf.mxu2 }
 0x102   : > { %v1933_v19 = vpop.f32.mrf.mxu0 }
 0x108   : > { %1472 = vmatmul.msk.bf16.gmra.mxu1 %vm897_vm2, %v860_v11 }
 0x10a   : > { %v572_v28 = vpop.f32.mrf.mxu0 }
 0x112   : > { %v574_v35 = vpop.f32.mrf.mxu0 }
 0x115   : > { %v955_v21 = vpop.f32.mrf.mxu1 }
 0x116   : > { %v1883_v23 = vmul.f32 %v955_v21, %v548_v18  ;;  %v614_v21 = vpop.f32.mrf.mxu2 }
 0x118   : > { %1473 = vmatmul.msk.bf16.gmra.mxu1 %vm897_vm2, %v861_v22 }
 0x11a   : > { %v577_v40 = vpop.f32.mrf.mxu0 }
 0x11d   : > { %v957_v29 = vpop.f32.mrf.mxu1 }
 0x11e   : > { %v1887_v30 = vmul.f32 %v957_v29, %v550_v25  ;;  %v568_v25 = vadd.f32 %v1876_v14, %v567_v9 }
 0x120   : > { %v1067_v32 = vpack.c.bf16 %v1887_v30, %v1883_v23 }
 0x123   : > { %v1005_v36 = vpop.f32.mrf.mxu3 }
 0x124   : > { %v1897_v38 = vmul.f32 %v1005_v36, %v598_v31  ;;  %v617_v31 = vpop.f32.mrf.mxu2 }
 0x125   : > { %v960_v39 = vpop.f32.mrf.mxu1  ;;  %v618_v60 = vadd.f32 %v1876_v14, %v617_v31 }
 0x126   : > { %v1899_v42 = vmul.f32 %v960_v39, %v553_v33 }
 0x128   : > { %1474 = vmatmul.msk.bf16.gmra.mxu1 %vm897_vm2, %v862_v41 }
 0x12b   : > { %v1007_v44 = vpop.f32.mrf.mxu3 }
 0x12c   : > { %v1904_v45 = vmul.f32 %v1007_v44, %v600_v52  ;;  %v619_v36 = vpop.f32.mrf.mxu2  ;;  %v579_v44 = vpop.f32.mrf.mxu0 }
 0x12d   : > { %v962_v46 = vpop.f32.mrf.mxu1 }
 0x12e   : > { %v1906_v47 = vmul.f32 %v962_v46, %v555_v43  ;;  %v1077_v49 = vpack.c.bf16 %v1904_v45, %v1897_v38  ;;  %v872_v38 = vld [vmem:[%s333_s19] sm:$0x3] }
 0x130   : > { %v1068_v53 = vpack.c.bf16 %v1906_v47, %v1899_v42  ;;  %v874_v42 = vperm.slane %v872_v38, 1 }
 0x133   : > { %v1010_v55 = vpop.f32.mrf.mxu3 }
 0x134   : > { %v1914_v56 = vmul.f32 %v1010_v55, %v603_v51  ;;  %v622_v52 = vpop.f32.mrf.mxu2  ;;  %v620_v55 = vadd.f32 %v1876_v14, %v619_v36 }
 0x135   : > { %v965_v58 = vpop.f32.mrf.mxu1  ;;  %v623_v51 = vadd.f32 %v1876_v14, %v622_v52 }
 0x136   : > { %v1916_v59 = vmul.f32 %v965_v58, %v558_v54 }
 0x13b   : > { %v1012_v0 = vpop.f32.mrf.mxu3 }
 0x13c   : > { %v1920_v2 = vmul.f32 %v1012_v0, %v605_v61  ;;  %v624_v50 = vpop.f32.mrf.mxu2  ;;  %v582_v0 = vpop.f32.mrf.mxu0 }
 0x13d   : > { %v967_v3 = vpop.f32.mrf.mxu1  ;;  %v625_v54 = vadd.f32 %v1876_v14, %v624_v50  ;;  %v583_v50 = vadd.f32 %v1876_v14, %v582_v0  ;;  %v1084_v0 = vld [vmem:[#allocation2 + $0x8] sm:$0xff] }
 0x13e   : > { %v1922_v4 = vmul.f32 %v967_v3, %v560_v63  ;;  %v1078_v5 = vpack.c.bf16 %v1920_v2, %v1914_v56 }
 0x140   : > { %v1069_v8 = vpack.c.bf16 %v1922_v4, %v1916_v59 }
 0x143   : > { %v1015_v11 = vpop.f32.mrf.mxu3 }
 0x144   : > { %v1059_v13 = vmul.f32 %v1015_v11, %v608_v6  ;;  %v615_v6 = vadd.f32 %v1876_v14, %v614_v21  ;;  %v613_v11 = vadd.f32 %v1876_v14, %v612_v12  ;;  %v580_v12 = vadd.f32 %v1876_v14, %v579_v44 }
 0x145   : > { %v970_v15 = vpop.f32.mrf.mxu1 }
 0x146   : > { %v1930_v16 = vmul.f32 %v970_v15, %v563_v10 }
 0x14b   : > { %v1017_v18 = vpop.f32.mrf.mxu3 }
 0x14d   : > { %v972_v20 = vpop.f32.mrf.mxu1 }
 0x14e   : > { %v1935_v22 = vmul.f32 %v972_v20, %v565_v17  ;;  %v610_v17 = vadd.f32 %v1876_v14, %v609_v62  ;;  %v578_v62 = vadd.f32 %v1876_v14, %v577_v40 }
 0x150   : > { %v1070_v24 = vpack.c.bf16 %v1935_v22, %v1930_v16  ;;  %v1060_v31 = vmul.f32 %v1017_v18, %v610_v17  ;;  %v595_v22 = vadd.f32 %v1876_v14, %v1866_v7 }
 0x153   : > { %v1020_v26 = vpop.f32.mrf.mxu3 }
 0x155   : > { %v975_v27 = vpop.f32.mrf.mxu1 }
 0x156   : > { %v1940_v29 = vmul.f32 %v975_v27, %v568_v25  ;;  %v1061_v27 = vmul.f32 %v1020_v26, %v613_v11  ;;  %v575_v26 = vadd.f32 %v1876_v14, %v574_v35 }
 0x15b   : > { %v1022_v33 = vpop.f32.mrf.mxu3 }
 0x15c   : > { %v1062_v20 = vmul.f32 %v1022_v33, %v615_v6 }
 0x15d   : > { %v977_v34 = vpop.f32.mrf.mxu1 }
 0x15e   : > { %v1080_v52 = vpack.c.bf16 %v1062_v20, %v1061_v27 }
 0x163   : > { %v1025_v37 = vpop.f32.mrf.mxu3 }
 0x164   : > { %v1063_v15 = vmul.f32 %v1025_v37, %v618_v60 }
 0x165   : > { %v980_v39 = vpop.f32.mrf.mxu1 }
 0x16b   : > { %v1027_v41 = vpop.f32.mrf.mxu3 }
 0x16c   : > { %v1064_v9 = vmul.f32 %v1027_v41, %v620_v55  ;;  %v1079_v41 = vpack.c.bf16 %v1060_v31, %v1059_v13  ;;  %v573_v55 = vadd.f32 %v1876_v14, %v572_v28  ;;  %v570_v13 = vadd.f32 %v1876_v14, %v1933_v19 }
 0x16d   : > { %v982_v43 = vpop.f32.mrf.mxu1  ;;  %v870_v19 = vshrl.u32 %v627_v48, 7  ;;  %v593_v48 = vadd.f32 %v1876_v14, %v1861_v1 }
 0x16e   : > { %v1081_v25 = vpack.c.bf16 %v1064_v9, %v1063_v15  ;;  %v1046_v44 = vmul.f32 %v982_v43, %v575_v26  ;;  %v1045_v60 = vmul.f32 %v980_v39, %v573_v55  ;;  %v1044_v56 = vmul.f32 %v977_v34, %v570_v13 }
 0x16f   : > { %vm876_vm5 = vcmp.eq.s32.totalorder %v874_v42, %v870_v19 }
 0x170   : > { %v1072_v2 = vpack.c.bf16 %v1046_v44, %v1045_v60 }
 0x173   : > { %v1030_v46 = vpop.f32.mrf.mxu3 }
 0x174   : > { %v1065_v61 = vmul.f32 %v1030_v46, %v623_v51  ;;  %v584_v46 = vpop.f32.mrf.mxu0 }
 0x175   : > { %v985_v57 = vpop.f32.mrf.mxu1  ;;  %v585_v21 = vadd.f32 %v1876_v14, %v584_v46 }
 0x17b   : > { %v1032_v58 = vpop.f32.mrf.mxu3 }
 0x17c   : > { %v1066_v63 = vmul.f32 %v1032_v58, %v625_v54  ;;  %v1047_v58 = vmul.f32 %v985_v57, %v578_v62  ;;  %v587_v57 = vpop.f32.mrf.mxu0 }
 0x17d   : > { %v987_v3 = vpop.f32.mrf.mxu1 }
 0x17e   : > { %v1082_v10 = vpack.c.bf16 %v1066_v63, %v1065_v61  ;;  %v1048_v54 = vmul.f32 %v987_v3, %v580_v12  ;;  %v1083_v61 = vld [vmem:[#allocation2] sm:$0xff] }
 0x180   : > { %1099 = vmatpush.bf16.msrb.mxu3 %v1082_v10  ;;  %v1073_v35 = vpack.c.bf16 %v1048_v54, %v1047_v58 }
 0x184   : > { %1100 = vmatpush.bf16.msrb.mxu3 %v1081_v25  ;;  %v589_v34 = vpop.f32.mrf.mxu0 }
 0x185   : > { %v990_v36 = vpop.f32.mrf.mxu1  ;;  %v590_v59 = vadd.f32 %v1876_v14, %v589_v34 }
 0x186   : > { %v1049_v33 = vmul.f32 %v990_v36, %v583_v50 }
 0x188   : > { %1101 = vmatpush.bf16.msrb.mxu3 %v1080_v52 }
 0x18c   : > { %1102 = vmatpush.bf16.msrb.mxu3 %v1079_v41 }
 0x18d   : > { %v992_v37 = vpop.f32.mrf.mxu1 }
 0x18e   : > { %v1050_v51 = vmul.f32 %v992_v37, %v585_v21 }
 0x190   : > { %1103 = vmatpush.bf16.msrb.mxu3 %v1078_v5  ;;  %v1074_v18 = vpack.c.bf16 %v1050_v51, %v1049_v33  ;;  %v1071_v5 = vpack.c.bf16 %v1044_v56, %v1940_v29  ;;  %v873_v29 = vperm.slane %v872_v38, 0 }
 0x192   : > { %1085 = vmatpush.bf16.msrb.mxu2 %v1074_v18  ;;  %vm1979_vm2 = vcmp.eq.s32.totalorder %v873_v29, %v870_v19 }
 0x194   : > { %1104 = vmatpush.bf16.msrb.mxu3 %v1077_v49  ;;  %v871_v49 = vadd.s32 8, %v870_v19 }
 0x195   : > { %v995_v40 = vpop.f32.mrf.mxu1 }
 0x196   : > { %1086 = vmatpush.bf16.msrb.mxu2 %v1073_v35  ;;  %vm877_vm3 = vcmp.eq.s32.totalorder %v873_v29, %v871_v49  ;;  %vm878_vm6 = vcmp.eq.s32.totalorder %v874_v42, %v871_v49 }
 0x197   : > { %vm1481_vm4 = vmpackc.low %vm877_vm3, %vm1979_vm2 }
 0x198   : > { %vm1483_vm7 = vmpackc.low %vm878_vm6, %vm876_vm5 }
 0x19a   : > { %1087 = vmatpush.bf16.msrb.mxu2 %v1072_v2 }
 0x19d   : > { %v997_v28 = vpop.f32.mrf.mxu1 }
 0x19e   : > { %1088 = vmatpush.bf16.msrb.mxu2 %v1071_v5  ;;  %v1052_v47 = vmul.f32 %v997_v28, %v590_v59 }
 0x1a2   : > { %1089 = vmatpush.bf16.msrb.mxu2 %v1070_v24 }
 0x1a5   : > { %v1000_v45 = vpop.f32.mrf.mxu1 }
 0x1a6   : > { %1090 = vmatpush.bf16.msrb.mxu2 %v1069_v8  ;;  %v588_v8 = vadd.f32 %v1876_v14, %v587_v57  ;;  %v1053_v24 = vmul.f32 %v1000_v45, %v593_v48 }
 0x1a8   : > { %v1051_v7 = vmul.f32 %v995_v40, %v588_v8 }
 0x1aa   : > { %1091 = vmatpush.bf16.msrb.mxu2 %v1068_v53  ;;  %v1643_v53 = vmov 1.0|1.0   ;;  %v1075_v43 = vpack.c.bf16 %v1052_v47, %v1051_v7 }
 0x1ad   : > { %v1002_v4 = vpop.f32.mrf.mxu1 }
 0x1ae   : > { %v1054_v39 = vmul.f32 %v1002_v4, %v595_v22  ;;  %1092 = vmatpush.bf16.msrb.mxu2 %v1067_v32 }
 0x1b0   : > { %v1076_v1 = vpack.c.bf16 %v1054_v39, %v1053_v24 }
 0x1b1   : > { %1482 = vmatmul.msk.bf16.vlgmr.msrb.gmra.mxu2 %vm1481_vm4, %v1643_v53 }
 0x1b2   : > { %1105 = vmatpush.bf16.msrb.mxu3 %v1076_v1 }
 0x1b6   : > { %1106 = vmatpush.bf16.msrb.mxu3 %v1075_v43 }
 0x1b9   : > { %1484 = vmatmul.msk.bf16.vlgmr.msrb.gmra.mxu3 %vm1483_vm7, %v1643_v53 }
 0x234   : > { %v1094_v14 = vpop.f32.mrf.mxu2 }
 0x23c   : > { %v1108_v23 = vpop.f32.mrf.mxu3  ;;  %v1096_v63 = vpop.f32.mrf.mxu2 }
 0x23d   : > { %v1109_v30 = vadd.f32 %v1108_v23, %v1094_v14 }
 0x23f   : > { %v1113_v32 = vadd.f32 %v1109_v30, %v1083_v61 }
 0x241   : > { %1115 = vst [vmem:[#allocation2] sm:$0xff] %v1113_v32 }
 0x244   : > { %v1110_v3 = vpop.f32.mrf.mxu3 }
 0x245   : > { %v1111_v6 = vadd.f32 %v1110_v3, %v1096_v63  ;;  %1120 = sbr.rel (%p1485_p6) target bundleno = 785 (0x311), region = 60 }
 0x247   : > { %v1114_v9 = vadd.f32 %v1111_v6, %v1084_v0 }
 0x249   : > { %1116 = vst [vmem:[#allocation2 + $0x8] sm:$0xff] %v1114_v9 }
 0x24a   : > { %v1556_v10 = vld [vmem:[%s2035_s6 + $0x38] sm:$0xff]  ;;  %v1555_v11 = vld [vmem:[%s2035_s6 + $0x30] sm:$0xff]  ;;  %v1554_v15 = vld [vmem:[%s2035_s6 + $0x28] sm:$0xff] }
 0x24b   : > { %1192 = vmatpush.bf16.msra.mxu0 %v1556_v10  ;;  %v1553_v17 = vld [vmem:[%s2035_s6 + $0x20] sm:$0xff]  ;;  %v1552_v20 = vld [vmem:[%s2035_s6 + $0x18] sm:$0xff]  ;;  %v1551_v25 = vld [vmem:[%s2035_s6 + $0x10] sm:$0xff] }
 0x24c   : > { %v1550_v27 = vld [vmem:[%s2035_s6 + $0x8] sm:$0xff]  ;;  %v1549_v36 = vld [vmem:[%s2035_s6] sm:$0xff] }
 0x24d   : > { %v1121_v31 = vld [vmem:[#allocation2] sm:$0xff] }
 0x24e   : > { %v1591_v50 = vld [vmem:[%s2036_s7] ss:$0 sm:$0xff] }
 0x24f   : > { %1193 = vmatpush.bf16.msra.mxu0 %v1555_v11 }
 0x250   : > { %v1122_v52 = vld [vmem:[#allocation2 + $0x8] sm:$0xff] }
 0x251   : > { %v1123_v46 = vpack.c.bf16 %v1122_v52, %v1121_v31 }
 0x253   : > { %1194 = vmatpush.bf16.msra.mxu0 %v1554_v15 }
 0x257   : > { %1195 = vmatpush.bf16.msra.mxu0 %v1553_v17 }
 0x25b   : > { %1196 = vmatpush.bf16.msra.mxu0 %v1552_v20 }
 0x25f   : > { %1197 = vmatpush.bf16.msra.mxu0 %v1551_v25 }
 0x263   : > { %1198 = vmatpush.bf16.msra.mxu0 %v1550_v27 }
 0x267   : > { %1199 = vmatpush.bf16.msra.mxu0 %v1549_v36 }
 0x26a   : > { %1200 = vmatmul.bf16.vlgmr.msra.gmra.mxu0 %v1123_v46 }
 0x2e7   : > { %v1201_v21 = vpop.f32.mrf.mxu0 }
 0x2e8   : > { %v1202_v41 = vadd.f32 %v1591_v50, %v1201_v21 }
 0x2ea   : > { %v1518_v12 = vmul.f32 -1.442695, %v1202_v41 }
 0x2ec   : > { %1592 = vpow2.f32 %v1518_v12 }
 0x2ef   : > { %v1203_v37 = vpop.f32.mrf.mxu0 }
 0x2f0   : > { %v1204_v62 = vadd.f32 %v1591_v50, %v1203_v37 }
 0x2f2   : > { %v1593_v33 = vpop.eup %1592  ;;  %v1519_v51 = vmul.f32 -1.442695, %v1204_v62 }
 0x2f3   : > { %v1212_v26 = vadd.f32 1.0, %v1593_v33 }
 0x2f4   : > { %1594 = vpow2.f32 %v1519_v51 }
 0x2f5   : > { %1596 = vrcp.f32 %v1212_v26  ;;  %v1225_v44 = vand.u32 2147483648, %v1212_v26  ;;  %v1223_v40 = vand.u32 2147483647, %v1212_v26  ;;  %vm1219_vm9 = vweird.f32 %v1212_v26 }
 0x2f7   : > { %v1226_v2 = vor.u32 1.1754944e-38, %v1225_v44  ;;  %vm1224_vm11 = vcmp.eq.f32.partialorder %v1223_v40, 8.507059e+37 }
 0x2fa   : > { %v1595_v54 = vpop.eup %1594 }
 0x2fb   : > { %v1597_v18 = vpop.eup %1596  ;;  %v1213_v55 = vadd.f32 1.0, %v1595_v54 }
 0x2fc   : > { %v1215_v58 = vmul.f32 %v1597_v18, %v1212_v26  ;;  %vm1220_vm8 = vweird.f32 %v1597_v18 }
 0x2fd   : > { %1598 = vrcp.f32 %v1213_v55  ;;  %vm1221_vm10 = vmor %vm1219_vm9, %vm1220_vm8  ;;  %v1240_v45 = vand.u32 2147483648, %v1213_v55  ;;  %v1238_v29 = vand.u32 2147483647, %v1213_v55  ;;  %vm1234_vm13 = vweird.f32 %v1213_v55 }
 0x2fe   : > { %v1216_v13 = vsub.f32 1.0, %v1215_v58 }
 0x2ff   : > { %v1241_v16 = vor.u32 1.1754944e-38, %v1240_v45  ;;  %vm1239_vm15 = vcmp.eq.f32.partialorder %v1238_v29, 8.507059e+37 }
 0x300   : > { %v1217_v35 = vmul.f32 %v1597_v18, %v1216_v13 }
 0x302   : > { %v1218_v60 = vadd.f32 %v1597_v18, %v1217_v35 }
 0x303   : > { %v1599_v56 = vpop.eup %1598 }
 0x304   : > { %v1222_v5 = vsel %vm1221_vm10, %v1597_v18, %v1218_v60  ;;  %v1230_v28 = vmul.f32 %v1599_v56, %v1213_v55  ;;  %vm1235_vm12 = vweird.f32 %v1599_v56 }
 0x305   : > { %v1227_v57 = vsel %vm1224_vm11, %v1226_v2, %v1222_v5  ;;  %vm1236_vm14 = vmor %vm1234_vm13, %vm1235_vm12 }
 0x306   : > { %v1244_v19 = vmul.f32 %v1227_v57, %v1202_v41  ;;  %v1231_v38 = vsub.f32 1.0, %v1230_v28 }
 0x308   : > { %1246 = vst [vmem:[#allocation3] sm:$0xff] %v1244_v19  ;;  %v1232_v49 = vmul.f32 %v1599_v56, %v1231_v38 }
 0x30a   : > { %v1233_v34 = vadd.f32 %v1599_v56, %v1232_v49 }
 0x30c   : > { %v1237_v48 = vsel %vm1236_vm14, %v1599_v56, %v1233_v34 }
 0x30d   : > { %v1242_v22 = vsel %vm1239_vm15, %v1241_v16, %v1237_v48 }
 0x30e   : > { %v1245_v59 = vmul.f32 %v1242_v22, %v1204_v62 }
 0x310   : > { %1247 = vst [vmem:[#allocation3 + $0x8] sm:$0xff] %v1245_v59 }
 0x311 PF: > { %p1570_p7 = scmp.eq.s32.totalorder %s1698_s28, 1  ;;  %s1644_s22 = smov [#allocation3]  }
 0x312   : > { %s1253_s23 = sshll.u32 %s1644_s22, 4  ;;  %s1255_s24 = sshll.u32 %s2037_s8, 4  ;;  %s1254_s23 = int_to_ptr.vmem [resolvable:$true] %s1253_s23  ;;  %s1256_s24 = int_to_ptr.hbm [resolvable:$true] %s1255_s24 }
 0x313   : > { %s1645_s25 = smov 128   ;;  %s1646_s26 = smov 8  }
 0x314   : > { %1567 = dma.vmem_to_hbm [thread:$0]  (%p1570_p7), %s1254_s23, 256, %s1256_s24, [#allocation4], %s1645_s25, %s1645_s25, %s1646_s26  }
 0x315   : > { %1633 = dma.done.wait (%p1570_p7), [#allocation4], 256  }
 0x316   : > { %1635 = vsyncadd (%p1570_p7), [#allocation4], 4294967040 }
 0x317 PF: > { %s19_s27 = sadd.s32 1, %s1638_s27  }
 0x318   : > { %p16_p8 = scmp.ge.s32.totalorder %s19_s27, 4  }
 0x31a   :  { %18 = sbr.rel (!%p16_p8) target bundleno = 1 (0x1), region = 93 }
 0x31f   :  { %1272 = vsyncpa [#allocation4], 1 }
 0x320   :  { %1274 = vsyncpa [#allocation4 + $0x1], 1 }

</bundles_post_ra>
